<compile_context>
chip_gen: v7x
topology: tpu7x:2x2x1
jax: 0.10.0
libtpu: 0.0.40
codegen_flags: <defaults>
</compile_context>

<pallas_src>
import jax
import jax.numpy as jnp
from jax.experimental import pallas as pl
from jax.experimental.pallas import tpu as pltpu


# < v7x's 64 MiB physical VMEM with headroom; well under v5e/v6e 128 MiB.
_VMEM_LIMIT_BYTES = 48 * 1024 * 1024


def _add_kernel(x_ref, p_ref, o_ref):
    """Elementwise pass-through: o = x + perturb.

    astype() to an identical dtype is a traced no-op, so when x, perturb and
    the output share a dtype (e.g. all bf16) this is a native-width add with
    no f32 upcast / extra vreg pressure; mixed dtypes are converted to the
    result dtype before the add.
    """
    o_ref[...] = x_ref[...].astype(o_ref.dtype) + p_ref[...].astype(o_ref.dtype)


def base_model_forward(batched_data, perturb=None, *, target_block_bytes=4 * 1024 * 1024):
    """Pallas implementation of BaseModel.forward's pass-through semantics.

    batched_data: [N, C, H, W] (any float dtype; dtype semantics follow
                  jnp.result_type of the two inputs)
    perturb:      same shape as batched_data, or None
    returns:      same shape as batched_data
    """
    x = jnp.asarray(batched_data)

    # Identity path: no perturbation -> exact pass-through, zero extra HBM traffic.
    if perturb is None:
        return x

    p = jnp.asarray(perturb)
    assert p.shape == x.shape, "perturb must match batched_data shape"
    out_dtype = jnp.result_type(x.dtype, p.dtype)

    orig_shape = x.shape
    total = x.size

    if total == 0:
        return jnp.zeros(orig_shape, out_dtype)

    if total % 128 != 0:
        # Rare shape: routing this through the kernel would require pad/slice
        # (or bulk-slice/concat) round trips that add full extra HBM passes to
        # a bandwidth-bound op.  A single fused XLA add is the fastest correct
        # path here.
        return x.astype(out_dtype) + p.astype(out_dtype)

    # ---- lane-dense flatten: view all elements as (rows, lane), lane % 128 == 0,
    # so every vector store is a full-width unmasked vst.
    lane = 128
    for cand in (2048, 1024, 512, 256):
        if total % cand == 0:
            lane = cand
            break
    rows = total // lane
    x2 = x.reshape(rows, lane)
    p2 = p.reshape(rows, lane)

    itemsizes = [jnp.dtype(d).itemsize for d in (x.dtype, p.dtype, out_dtype)]
    max_item = max(itemsizes)
    min_item = min(itemsizes)
    # Native sublane packing: one vreg holds 8 rows of 4-byte, 16 rows of
    # 2-byte, 32 rows of 1-byte elements -> align block edges to that.
    sublane = max(8, 32 // min_item)

    # ---- block sizing: ~4 MiB per input block (3 arrays x 2 bufs ~= 24 MiB of
    # pipelined VMEM windows, declared via vmem_limit_bytes below).
    bytes_per_row = lane * max_item
    max_block_rows = max(sublane, (target_block_bytes // bytes_per_row) // sublane * sublane)

    if rows >= 2 * sublane:
        # Guarantee >=2 grid steps so the ("parallel",) axis can shard across
        # v7x's two TensorCores; a single full-extent block would idle one TC.
        cap = ((rows // 2) // sublane) * sublane
        block_rows = max(sublane, min(max_block_rows, cap))
    else:
        # Tiny tensor: a single full-extent block is always layout-legal.
        block_rows = rows

    grid = (pl.cdiv(rows, block_rows),)

    out2 = pl.pallas_call(
        _add_kernel,
        out_shape=jax.ShapeDtypeStruct((rows, lane), out_dtype),
        grid_spec=pltpu.PrefetchScalarGridSpec(
            num_scalar_prefetch=0,
            grid=grid,
            in_specs=[
                pl.BlockSpec((block_rows, lane), lambda i: (i, 0)),
                pl.BlockSpec((block_rows, lane), lambda i: (i, 0)),
            ],
            out_specs=pl.BlockSpec((block_rows, lane), lambda i: (i, 0)),
        ),
        compiler_params=pltpu.CompilerParams(
            dimension_semantics=("parallel",),
            vmem_limit_bytes=_VMEM_LIMIT_BYTES,
        ),
    )(x2, p2)

    return out2.reshape(orig_shape)


if __name__ == "__main__":
    key = jax.random.PRNGKey(0)
    k_x, k_p = jax.random.split(key)

    # Small NCHW batch consistent with the model family's batched_data input.
    x = jax.random.normal(k_x, (2, 4, 16, 16), dtype=jnp.float32)
    perturb = 0.01 * jax.random.normal(k_p, (2, 4, 16, 16), dtype=jnp.float32)

    # Perturbed pass-through (kernel path, single full-extent block).
    out = jax.block_until_ready(base_model_forward(x, perturb))
    ref = x + perturb
    assert out.shape == x.shape and out.dtype == x.dtype
    assert jnp.allclose(out, ref, atol=1e-6, rtol=1e-6)

    # perturb=None path: exact identity, no kernel / no extra HBM traffic.
    out_none = jax.block_until_ready(base_model_forward(x))
    assert jnp.allclose(out_none, x)

    # bf16 stays bf16 and adds natively in-kernel (no f32 upcast).
    xb = x.astype(jnp.bfloat16)
    pb = perturb.astype(jnp.bfloat16)
    outb = jax.block_until_ready(base_model_forward(xb, pb))
    refb = xb + pb
    assert outb.dtype == jnp.bfloat16
    assert jnp.allclose(outb.astype(jnp.float32), refb.astype(jnp.float32),
                        atol=1e-2, rtol=1e-2)

    # Multi-step grid path (rows=16 -> block_rows=8, grid=(2,)) — still small.
    x_big = jax.random.normal(k_x, (2, 4, 32, 128), dtype=jnp.float32)
    p_big = 0.01 * jax.random.normal(k_p, (2, 4, 32, 128), dtype=jnp.float32)
    out_big = jax.block_until_ready(base_model_forward(x_big, p_big))
    assert jnp.allclose(out_big, x_big + p_big, atol=1e-6, rtol=1e-6)

    # Non-128-divisible element count: fused XLA fallback (no pad/slice passes).
    x_odd = jax.random.normal(k_x, (2, 3, 5, 7), dtype=jnp.float32)
    p_odd = 0.01 * jax.random.normal(k_p, (2, 3, 5, 7), dtype=jnp.float32)
    out_odd = jax.block_until_ready(base_model_forward(x_odd, p_odd))
    assert jnp.allclose(out_odd, x_odd + p_odd, atol=1e-6, rtol=1e-6)

    print("KERNEL_OK")
</pallas_src>

<mosaic_0001>
module attributes {stable_mosaic.version = 11 : i64} {
  func.func @_add_kernel(%arg0: i32, %arg1: memref<1x2048xf32, #tpu.memory_space<vmem>>, %arg2: memref<1x2048xf32, #tpu.memory_space<vmem>>, %arg3: memref<1x2048xf32, #tpu.memory_space<vmem>>) attributes {dimension_semantics = [#tpu.dimension_semantics<parallel>], iteration_bounds = array<i64: 1>, scalar_prefetch = 0 : i64, scratch_operands = 0 : i64, tpu.core_type = #tpu.core_type<tc>, window_params = [{transform_indices = @transform_0, window_bounds = array<i64: 1, 2048>}, {transform_indices = @transform_1, window_bounds = array<i64: 1, 2048>}, {transform_indices = @transform_2, window_bounds = array<i64: 1, 2048>}]} {
    %c0 = arith.constant 0 : index
    %c0_0 = arith.constant 0 : index
    %0 = vector.load %arg1[%c0, %c0_0] : memref<1x2048xf32, #tpu.memory_space<vmem>>, vector<1x2048xf32>
    %c0_1 = arith.constant 0 : index
    %c0_2 = arith.constant 0 : index
    %1 = vector.load %arg2[%c0_1, %c0_2] : memref<1x2048xf32, #tpu.memory_space<vmem>>, vector<1x2048xf32>
    %2 = arith.addf %0, %1 : vector<1x2048xf32>
    %c0_3 = arith.constant 0 : index
    %c0_4 = arith.constant 0 : index
    %3 = vector.load %arg3[%c0_3, %c0_4] : memref<1x2048xf32, #tpu.memory_space<vmem>>, vector<1x2048xf32>
    tpu.vector_store %arg3[%c0_3, %c0_4], %2 {strides = array<i32>} : memref<1x2048xf32, #tpu.memory_space<vmem>>, vector<1x2048xf32>,
    return
  }
  func.func @transform_0(%arg0: i32) -> (i32, i32) {
    %c0_i32 = arith.constant 0 : i32
    %c0_i32_0 = arith.constant 0 : i32
    return %arg0, %c0_i32 : i32, i32
  }
  func.func @transform_1(%arg0: i32) -> (i32, i32) {
    %c0_i32 = arith.constant 0 : i32
    %c0_i32_0 = arith.constant 0 : i32
    return %arg0, %c0_i32 : i32, i32
  }
  func.func @transform_2(%arg0: i32) -> (i32, i32) {
    %c0_i32 = arith.constant 0 : i32
    %c0_i32_0 = arith.constant 0 : i32
    return %arg0, %c0_i32 : i32, i32
  }
}

</mosaic_0001>

<bundles_post_ra>
// kernel: tpu_custom_call.1
= control target key start
LH: loop header
LB: loop body
LE: loop exit
PB: predicated region body
PF: predicated region fallthrough
CT: control target
= control target key end

     0   :  { %7 = vsyncpa [#allocation3], 0  ;;  %s189_s0 = inlined_call_operand.hbm [shape: f32[1,2048], index: 0, kind: input, shape index: {}]   ;;  %s190_s1 = inlined_call_operand.hbm [shape: f32[1,2048], index: 1, kind: input, shape index: {}]   ;;  %s191_s2 = inlined_call_operand.hbm [shape: f32[1,2048], index: 2, kind: output, shape index: {}]  }
   0x1   :  { %8 = vsyncpa [#allocation6], 0 }
   0x2   :  { %9 = vsyncpa [#allocation4], 0  ;;  %s135_s9 = smov [#allocation2]   ;;  %s136_s11 = smov [#allocation5]  }
   0x3   :  { %s16_s10 = sshll.u32 %s135_s9, 4  ;;  %s26_s12 = sshll.u32 %s136_s11, 4  ;;  %s17_s10 = int_to_ptr.vmem [resolvable:$true] %s16_s10  ;;  %s27_s12 = int_to_ptr.vmem [resolvable:$true] %s26_s12 }
   0x4   :  { %s63_s15 = scalar_lea.hbm %s189_s0, 256 }
   0x5   :  { %p64_p0 = scmp.ne.s32.totalorder %s189_s0, %s63_s15  ;;  %p67_p1 = scmp.lt.u32.totalorder %s63_s15, %s189_s0 }
   0x7   :  { %p69_p2 = pnand %p67_p1, %p64_p0 }
   0x9   :  { %72 = shalt.err (!%p69_p2)
}
   0xa   :  { %s73_s20 = scalar_lea.vmem %s17_s10, 256  ;;  %p78_p4 = scmp.lt.s32.totalorder %s17_s10, %s17_s10 }
   0xb   :  { %p74_p3 = scmp.ne.s32.totalorder %s17_s10, %s73_s20  ;;  %p79_p5 = scmp.lt.s32.totalorder %s73_s20, %s73_s20 }
   0xd   :  { %p80_p6 = por %p79_p5, %p78_p4 }
   0xf   :  { %p81_p7 = pnand %p80_p6, %p74_p3 }
  0x11   :  { %84 = shalt.err (!%p81_p7)
}
  0x12   :  { %19 = dma.hbm_to_vmem [thread:$0]  %s189_s0, 256, %s17_s10, [#allocation3]  }
  0x13   :  { %s85_s25 = scalar_lea.hbm %s190_s1, 256 }
  0x14   :  { %p86_p8 = scmp.ne.s32.totalorder %s190_s1, %s85_s25  ;;  %p89_p9 = scmp.lt.u32.totalorder %s85_s25, %s190_s1 }
  0x16   :  { %p91_p10 = pnand %p89_p9, %p86_p8 }
  0x18   :  { %94 = shalt.err (!%p91_p10)
}
  0x19   :  { %s95_s30 = scalar_lea.vmem %s27_s12, 256  ;;  %p100_p12 = scmp.lt.s32.totalorder %s27_s12, %s27_s12 }
  0x1a   :  { %p96_p11 = scmp.ne.s32.totalorder %s27_s12, %s95_s30  ;;  %p101_p13 = scmp.lt.s32.totalorder %s95_s30, %s95_s30 }
  0x1c   :  { %p102_p0 = por %p101_p13, %p100_p12 }
  0x1e   :  { %p103_p1 = pnand %p102_p0, %p96_p11 }
  0x20   :  { %106 = shalt.err (!%p103_p1)
}
  0x21   :  { %29 = dma.hbm_to_vmem [thread:$0]  %s190_s1, 256, %s27_s12, [#allocation6]  }
  0x22   :  { %129 = dma.done.wait [#allocation3], 256  }
  0x23   :  { %130 = vsyncadd [#allocation3], 4294967040 }
  0x24   :  { %131 = dma.done.wait [#allocation6], 256  }
  0x25   :  { %132 = vsyncadd [#allocation6], 4294967040  ;;  %s137_s4 = smov [#allocation7]   ;;  %v36_v0 = vld [vmem:[#allocation2] sm:$0xff]  ;;  %v38_v1 = vld [vmem:[#allocation5] sm:$0xff] }
  0x26   :  { %s50_s5 = sshll.u32 %s137_s4, 4  ;;  %v37_v2 = vld [vmem:[#allocation2 + $0x8] sm:$0xff]  ;;  %v40_v3 = vadd.f32 %v38_v1, %v36_v0  ;;  %v39_v4 = vld [vmem:[#allocation5 + $0x8] sm:$0xff]  ;;  %s51_s5 = int_to_ptr.vmem [resolvable:$true] %s50_s5 }
  0x27   :  { %v41_v5 = vadd.f32 %v39_v4, %v37_v2  ;;  %s107_s6 = scalar_lea.vmem %s51_s5, 256  ;;  %p112_p3 = scmp.lt.s32.totalorder %s51_s5, %s51_s5 }
  0x28   :  { %42 = vst [vmem:[#allocation7] sm:$0xff] %v40_v3  ;;  %p108_p2 = scmp.ne.s32.totalorder %s51_s5, %s107_s6  ;;  %p113_p4 = scmp.lt.s32.totalorder %s107_s6, %s107_s6 }
  0x29   :  { %43 = vst [vmem:[#allocation7 + $0x8] sm:$0xff] %v41_v5 }
  0x2a   :  { %p114_p5 = por %p113_p4, %p112_p3 }
  0x2c   :  { %p115_p6 = pnand %p114_p5, %p108_p2 }
  0x2e   :  { %118 = shalt.err (!%p115_p6)
}
  0x2f   :  { %s119_s8 = scalar_lea.hbm %s191_s2, 256 }
  0x30   :  { %p120_p7 = scmp.ne.s32.totalorder %s191_s2, %s119_s8  ;;  %p123_p8 = scmp.lt.u32.totalorder %s119_s8, %s191_s2 }
  0x32   :  { %p125_p9 = pnand %p123_p8, %p120_p7 }
  0x34   :  { %128 = shalt.err (!%p125_p9)
}
  0x35   :  { %53 = dma.vmem_to_hbm [thread:$0]  %s51_s5, 256, %s191_s2, [#allocation4]  }
  0x36   :  { %133 = dma.done.wait [#allocation4], 256  }
  0x37   :  { %134 = vsyncadd [#allocation4], 4294967040 }
  0x38   :  { %57 = vsyncpa [#allocation3], 1 }
  0x39   :  { %58 = vsyncpa [#allocation6], 1 }
  0x3a   :  { %59 = vsyncpa [#allocation4], 1 }

</bundles_post_ra>
